<compile_context>
chip_gen: v7x
topology: tpu7x:2x2x1
jax: 0.10.0
libtpu: 0.0.40
codegen_flags: <defaults>
</compile_context>

<pallas_src>
import functools

import jax
import jax.numpy as jnp
from jax.experimental import pallas as pl
from jax.experimental.pallas import tpu as pltpu


# Set True to feed the MXU bf16 operands (f32 accumulation): large MXU-throughput and
# weight-HBM wins on v6e/v7x at ~1e-3 relative error. Precision tradeoff left to the
# model owner, so default is off (exact f32 semantics).
_USE_BF16_MXU = False

# Conservative per-call VMEM budget for double-buffered tiles (+ accumulator scratch).
# Fits v5e's 16 MiB scoped default; well under v6e (32 MiB) / v7x (32 MiB scoped).
_VMEM_BUDGET = 12 * 1024 * 1024


# ----------------------------- kernels ---------------------------------------

def _epilogue(z, activation, out_dtype):
    if activation == "sigmoid":
        return jax.nn.sigmoid(z).astype(out_dtype)
    if activation == "threshold":
        # sigmoid(z) >= 0.5  <=>  z >= 0 : skip the transcendental entirely.
        return (z >= 0.0).astype(out_dtype)
    return z.astype(out_dtype)


def _dot_t(x, w, cast_bf16):
    # x: (tm, tk), w: (tn, tk) in native torch (Out, In) layout.
    # Contract both on the last dim (trans_b form) -> no transpose anywhere.
    if cast_bf16:
        x = x.astype(jnp.bfloat16)
        w = w.astype(jnp.bfloat16)
    return jax.lax.dot_general(
        x, w, (((1,), (1,)), ((), ())), preferred_element_type=jnp.float32
    )


def _fullk_kernel(x_ref, w_ref, b_ref, o_ref, *, activation, cast_bf16):
    # Full reduction dim in one tile: no K axis, no accumulator scratch.
    z = _dot_t(x_ref[...], w_ref[...], cast_bf16) + b_ref[...]
    o_ref[...] = _epilogue(z, activation, o_ref.dtype)


def _ktiled_kernel(x_ref, w_ref, b_ref, o_ref, acc_ref, *, activation, cast_bf16):
    k = pl.program_id(2)

    @pl.when(k == 0)
    def _():
        acc_ref[...] = jnp.zeros_like(acc_ref)

    acc_ref[...] += _dot_t(x_ref[...], w_ref[...], cast_bf16)

    @pl.when(k == pl.num_programs(2) - 1)
    def _():
        z = acc_ref[...] + b_ref[...]
        o_ref[...] = _epilogue(z, activation, o_ref.dtype)


# ----------------------------- wrapper ---------------------------------------

def _round_up(x, m):
    return ((x + m - 1) // m) * m


def _pad2d(a, shape):
    pr, pc = shape[0] - a.shape[0], shape[1] - a.shape[1]
    if pr == 0 and pc == 0:
        return a
    return jnp.pad(a, ((0, pr), (0, pc)))


def _pick_divisor(dim, candidates):
    for c in candidates:
        if c <= dim and dim % c == 0:
            return c
    return None


def _linear_act(x, weight, bias, activation):
    """activation(x @ weight.T + bias); weight stays in torch (Out, In) layout."""
    B, In = x.shape
    Out, In_w = weight.shape
    assert In == In_w

    out_dtype = jnp.int8 if activation == "threshold" else x.dtype
    out_bytes = jnp.dtype(out_dtype).itemsize

    # Pad only to hardware minimums (sublane / 128-lane), NOT up to tile multiples.
    # For the int8 threshold output, round the batch to 32 so int8 store tiles always
    # satisfy the (32, 128) tiling constraint.
    sub = 32 if activation == "threshold" else 8
    Bp = _round_up(B, sub)
    Kp = _round_up(In, 128)
    Np = _round_up(Out, 128)

    # --- tile selection: pick tiles that divide the padded dims -------------------
    if Bp <= 512:
        tm = Bp
    else:
        tm = _pick_divisor(Bp, (512, 448, 384, 320, 256, 192, 128))
        if tm is None:  # awkward batch size: pad a little more, never > +120 rows
            Bp = _round_up(Bp, 128)
            tm = _pick_divisor(Bp, (512, 384, 256, 128))
    tn = Np if Np <= 512 else _pick_divisor(Np, (512, 384, 256, 128))

    x_p = _pad2d(x, (Bp, Kp))
    w_p = _pad2d(weight, (Np, Kp))              # (Out, In) layout, never transposed
    b_p = _pad2d(bias.reshape(1, Out), (1, Np))

    kern_kw = dict(activation=activation, cast_bf16=_USE_BF16_MXU)

    # ---- Path A: full-K tiles (weight block resident across the batch loop) ------
    fullk_vmem = 2 * (tm * Kp * 4 + tn * Kp * 4 + tm * tn * out_bytes + tn * 4)
    if fullk_vmem <= _VMEM_BUDGET:
        # N outermost: each (tn, Kp) weight block is DMA'd exactly once and stays
        # resident while the inner M loop streams x. Both axes parallel -> >=2 blocks
        # uses both TensorCores on v7x.
        grid = (Np // tn, Bp // tm)
        out = pl.pallas_call(
            functools.partial(_fullk_kernel, **kern_kw),
            out_shape=jax.ShapeDtypeStruct((Bp, Np), out_dtype),
            grid=grid,
            in_specs=[
                pl.BlockSpec((tm, Kp), lambda j, i: (i, 0)),
                pl.BlockSpec((tn, Kp), lambda j, i: (j, 0)),
                pl.BlockSpec((1, tn), lambda j, i: (0, j)),
            ],
            out_specs=pl.BlockSpec((tm, tn), lambda j, i: (i, j)),
            compiler_params=pltpu.CompilerParams(
                dimension_semantics=("parallel", "parallel")),
        )(x_p, w_p, b_p)
    else:
        # ---- Path B: K-tiled matmul, f32 VMEM accumulator, K as the last axis ----
        tk = 128  # guaranteed fallback (always divides Kp, always fits budget)
        for cand in (2048, 1536, 1024, 768, 512, 384, 256, 128):
            vmem = (2 * (tm * cand * 4 + tn * cand * 4 + tm * tn * out_bytes + tn * 4)
                    + tm * tn * 4)
            if Kp % cand == 0 and vmem <= _VMEM_BUDGET:
                tk = cand
                break
        grid = (Bp // tm, Np // tn, Kp // tk)
        out = pl.pallas_call(
            functools.partial(_ktiled_kernel, **kern_kw),
            out_shape=jax.ShapeDtypeStruct((Bp, Np), out_dtype),
            grid=grid,
            in_specs=[
                pl.BlockSpec((tm, tk), lambda i, j, k: (i, k)),
                pl.BlockSpec((tn, tk), lambda i, j, k: (j, k)),
                pl.BlockSpec((1, tn), lambda i, j, k: (0, j)),
            ],
            out_specs=pl.BlockSpec((tm, tn), lambda i, j, k: (i, j)),
            scratch_shapes=[pltpu.VMEM((tm, tn), jnp.float32)],
            compiler_params=pltpu.CompilerParams(
                dimension_semantics=("parallel", "parallel", "arbitrary")),
        )(x_p, w_p, b_p)

    return out[:B, :Out]


@jax.jit
def perceptron_forward(x, weight, bias):
    """Model.forward: sigmoid(x @ weight.T + bias)."""
    return _linear_act(x, weight, bias, "sigmoid")


@jax.jit
def perceptron_predict(x, weight, bias):
    """Model.predict, elementwise: fused in-kernel threshold (sigmoid skipped), int8 0/1."""
    # TODO(synk): torch predict() is a scalar Python if/else; generalized to elementwise.
    return _linear_act(x, weight, bias, "threshold")


# ----------------------------- test ------------------------------------------

if __name__ == "__main__":
    key = jax.random.PRNGKey(0)
    keys = jax.random.split(key, 12)

    def make(kx, kw, kb, B, In, Out):
        bound = 1.0 / (In ** 0.5)
        x = jax.random.normal(kx, (B, In), dtype=jnp.float32)
        w = jax.random.uniform(kw, (Out, In), jnp.float32, -bound, bound)
        b = jax.random.uniform(kb, (Out,), jnp.float32, -bound, bound)
        return x, w, b

    def ref_fwd(x, w, b):
        return jax.nn.sigmoid(jnp.dot(x, w.T, precision="highest") + b)

    # 1) Toy size matching the module (single full-K block).
    x, w, b = make(keys[0], keys[1], keys[2], 8, 32, 8)
    out = jax.block_until_ready(perceptron_forward(x, w, b))
    ref = ref_fwd(x, w, b)
    assert out.shape == (8, 8)
    assert jnp.allclose(out, ref, atol=1e-5, rtol=1e-5)
    cls = jax.block_until_ready(perceptron_predict(x, w, b))
    assert cls.shape == (8, 8) and cls.dtype == jnp.int8
    assert jnp.array_equal(cls, (ref >= 0.5).astype(jnp.int8))

    # 2) Already hardware-aligned size: runs at native 384x640x384, no padding.
    x, w, b = make(keys[3], keys[4], keys[5], 384, 640, 384)
    out = jax.block_until_ready(perceptron_forward(x, w, b))
    assert out.shape == (384, 384)
    assert jnp.allclose(out, ref_fwd(x, w, b), atol=1e-4, rtol=1e-4)

    # 3) Multi-block full-K path (grid over N and M, weight block resident) + int8 predict.
    x, w, b = make(keys[6], keys[7], keys[8], 640, 256, 1024)
    out = jax.block_until_ready(perceptron_forward(x, w, b))
    ref = ref_fwd(x, w, b)
    assert out.shape == (640, 1024)
    assert jnp.allclose(out, ref, atol=1e-4, rtol=1e-4)
    cls = jax.block_until_ready(perceptron_predict(x, w, b))
    assert cls.dtype == jnp.int8
    assert jnp.array_equal(cls, (ref >= 0.5).astype(jnp.int8))

    # 4) K-tiled accumulator path (weight too large for full-K VMEM residency).
    x, w, b = make(keys[9], keys[10], keys[11], 256, 4096, 1024)
    out = jax.block_until_ready(perceptron_forward(x, w, b))
    assert out.shape == (256, 1024)
    assert jnp.allclose(out, ref_fwd(x, w, b), atol=1e-4, rtol=1e-4)

    print("KERNEL_OK")
</pallas_src>

<mosaic_0001>
module attributes {stable_mosaic.version = 11 : i64} {
  func.func @_fullk_kernel(%arg0: i32, %arg1: i32, %arg2: memref<8x128xf32, #tpu.memory_space<vmem>>, %arg3: memref<128x128xf32, #tpu.memory_space<vmem>>, %arg4: memref<1x128xf32, #tpu.memory_space<vmem>>, %arg5: memref<8x128xf32, #tpu.memory_space<vmem>>) attributes {dimension_semantics = [#tpu.dimension_semantics<parallel>, #tpu.dimension_semantics<parallel>], iteration_bounds = array<i64: 1, 1>, scalar_prefetch = 0 : i64, scratch_operands = 0 : i64, tpu.core_type = #tpu.core_type<tc>, window_params = [{transform_indices = @transform_0, window_bounds = array<i64: 8, 128>}, {transform_indices = @transform_1, window_bounds = array<i64: 128, 128>}, {transform_indices = @transform_2, window_bounds = array<i64: 1, 128>}, {transform_indices = @transform_3, window_bounds = array<i64: 8, 128>}]} {
    %c0 = arith.constant 0 : index
    %c0_0 = arith.constant 0 : index
    %0 = vector.load %arg2[%c0, %c0_0] : memref<8x128xf32, #tpu.memory_space<vmem>>, vector<8x128xf32>
    %c0_1 = arith.constant 0 : index
    %c0_2 = arith.constant 0 : index
    %1 = vector.load %arg3[%c0_1, %c0_2] : memref<128x128xf32, #tpu.memory_space<vmem>>, vector<128x128xf32>
    %cst = arith.constant dense<0.000000e+00> : vector<8x128xf32>
    %2 = tpu.matmul %0, %1, %cst {dimension_numbers = #tpu.dot_dimension_numbers<[1], [1], [0], [0], [0, 0, 1, 0], [], []>} : vector<8x128xf32>, vector<128x128xf32>, vector<8x128xf32> -> vector<8x128xf32>
    %c0_3 = arith.constant 0 : index
    %c0_4 = arith.constant 0 : index
    %3 = vector.load %arg4[%c0_3, %c0_4] : memref<1x128xf32, #tpu.memory_space<vmem>>, vector<1x128xf32>
    %4 = vector.broadcast %3 : vector<1x128xf32> to vector<8x128xf32>
    %5 = arith.addf %2, %4 : vector<8x128xf32>
    %6 = arith.negf %5 : vector<8x128xf32>
    %7 = math.exp %6 : vector<8x128xf32>
    %cst_5 = arith.constant 1.000000e+00 : f32
    %8 = vector.broadcast %cst_5 : f32 to vector<8x128xf32>
    %9 = arith.addf %8, %7 : vector<8x128xf32>
    %10 = arith.divf %8, %9 : vector<8x128xf32>
    %c0_6 = arith.constant 0 : index
    %c0_7 = arith.constant 0 : index
    %11 = vector.load %arg5[%c0_6, %c0_7] : memref<8x128xf32, #tpu.memory_space<vmem>>, vector<8x128xf32>
    tpu.vector_store %arg5[%c0_6, %c0_7], %10 {strides = array<i32>} : memref<8x128xf32, #tpu.memory_space<vmem>>, vector<8x128xf32>,
    return
  }
  func.func @transform_0(%arg0: i32, %arg1: i32) -> (i32, i32) {
    %c0_i32 = arith.constant 0 : i32
    %c0_i32_0 = arith.constant 0 : i32
    return %arg1, %c0_i32 : i32, i32
  }
  func.func @transform_1(%arg0: i32, %arg1: i32) -> (i32, i32) {
    %c0_i32 = arith.constant 0 : i32
    %c0_i32_0 = arith.constant 0 : i32
    return %arg0, %c0_i32 : i32, i32
  }
  func.func @transform_2(%arg0: i32, %arg1: i32) -> (i32, i32) {
    %c0_i32 = arith.constant 0 : i32
    %c0_i32_0 = arith.constant 0 : i32
    return %c0_i32, %arg0 : i32, i32
  }
  func.func @transform_3(%arg0: i32, %arg1: i32) -> (i32, i32) {
    %c0_i32 = arith.constant 0 : i32
    return %arg1, %arg0 : i32, i32
  }
}

</mosaic_0001>

<bundles_post_ra>
// kernel: perceptron_forward.1
= control target key start
LH: loop header
LB: loop body
LE: loop exit
PB: predicated region body
PF: predicated region fallthrough
CT: control target
= control target key end

     0   :  { %v240_v2 = vmov 0.0|0.0   ;;  %vm241_vm0 = vmmov 0   ;;  %v242_v4 = vmov 0.0   ;;  %s330_s0 = inlined_call_operand.vmem [shape: f32[8,128], index: 0, kind: input, shape index: {}]   ;;  %s331_s1 = inlined_call_operand.vmem [shape: f32[128,128], index: 1, kind: input, shape index: {}]   ;;  %s332_s2 = inlined_call_operand.vmem [shape: f32[1,128], index: 2, kind: input, shape index: {}]   ;;  %s333_s3 = inlined_call_operand.hbm [shape: f32[8,128], index: 3, kind: output, shape index: {}]  }
   0x1   :  { %v16_v0 = vld [vmem:[%s331_s1] sm:$0xff]  ;;  %v17_v1 = vld [vmem:[%s331_s1 + $0x8] sm:$0xff]  ;;  %184 = vmatprep.subr.bf16.mxu0 %v240_v2  ;;  %181 = vmatprep.mubr.msk.f32.mxu0 %vm241_vm0, %v242_v4  ;;  %v18_v5 = vld [vmem:[%s331_s1 + $0x10] sm:$0xff] }
   0x2   :  { %v185_v3 = vpack.c.bf16 %v17_v1, %v16_v0  ;;  %v19_v6 = vld [vmem:[%s331_s1 + $0x18] sm:$0xff] }
   0x4   :  { %186 = vmatpush3.bf16.xpose.msra.mxu0 %v185_v3 }
   0x5   :  { %187 = vmatprep.subr.bf16.mxu0 %v240_v2 }
   0x6   :  { %8 = vsyncpa [#allocation3], 0  ;;  %v188_v7 = vpack.c.bf16 %v19_v6, %v18_v5  ;;  %v20_v8 = vld [vmem:[%s331_s1 + $0x20] sm:$0xff]  ;;  %v21_v9 = vld [vmem:[%s331_s1 + $0x28] sm:$0xff] }
   0x7   :  { %v191_v10 = vpack.c.bf16 %v21_v9, %v20_v8  ;;  %v22_v11 = vld [vmem:[%s331_s1 + $0x30] sm:$0xff]  ;;  %v23_v12 = vld [vmem:[%s331_s1 + $0x38] sm:$0xff]  ;;  %v24_v14 = vld [vmem:[%s331_s1 + $0x40] sm:$0xff] }
   0x8   :  { %v194_v13 = vpack.c.bf16 %v23_v12, %v22_v11  ;;  %v25_v15 = vld [vmem:[%s331_s1 + $0x48] sm:$0xff]  ;;  %v26_v17 = vld [vmem:[%s331_s1 + $0x50] sm:$0xff]  ;;  %v27_v18 = vld [vmem:[%s331_s1 + $0x58] sm:$0xff] }
   0x9   :  { %v197_v16 = vpack.c.bf16 %v25_v15, %v24_v14  ;;  %v200_v19 = vpack.c.bf16 %v27_v18, %v26_v17  ;;  %v28_v20 = vld [vmem:[%s331_s1 + $0x60] sm:$0xff]  ;;  %v29_v21 = vld [vmem:[%s331_s1 + $0x68] sm:$0xff]  ;;  %v30_v23 = vld [vmem:[%s331_s1 + $0x70] sm:$0xff] }
   0xa   :  { %v203_v22 = vpack.c.bf16 %v29_v21, %v28_v20  ;;  %v31_v24 = vld [vmem:[%s331_s1 + $0x78] sm:$0xff]  ;;  %v15_v26 = vld [vmem:[%s330_s0] sm:$0xff]  ;;  %s243_s1 = smov [#allocation2]  }
   0xb   :  { %v206_v25 = vpack.c.bf16 %v31_v24, %v30_v23  ;;  %v130_v27 = vld [vmem:[%s332_s2] ss:$0 sm:$0xff]  ;;  %s122_s21 = sshll.u32 %s243_s1, 4  ;;  %s123_s21 = int_to_ptr.vmem [resolvable:$true] %s122_s21 }
   0xc   :  { %189 = vmatpush3.bf16.xpose.msra.mxu0 %v188_v7  ;;  %s216_s22 = scalar_lea.vmem %s123_s21, 128  ;;  %p221_p1 = scmp.lt.s32.totalorder %s123_s21, %s123_s21 }
   0xd   :  { %190 = vmatprep.subr.bf16.mxu0 %v240_v2  ;;  %p217_p0 = scmp.ne.s32.totalorder %s123_s21, %s216_s22  ;;  %p222_p2 = scmp.lt.s32.totalorder %s216_s22, %s216_s22 }
   0xf   :  { %p223_p3 = por %p222_p2, %p221_p1 }
  0x11   :  { %p224_p4 = pnand %p223_p3, %p217_p0 }
  0x14   :  { %192 = vmatpush3.bf16.xpose.msra.mxu0 %v191_v10 }
  0x15   :  { %193 = vmatprep.subr.bf16.mxu0 %v240_v2 }
  0x1c   :  { %195 = vmatpush3.bf16.xpose.msra.mxu0 %v194_v13 }
  0x1d   :  { %196 = vmatprep.subr.bf16.mxu0 %v240_v2 }
  0x24   :  { %198 = vmatpush3.bf16.xpose.msra.mxu0 %v197_v16 }
  0x25   :  { %199 = vmatprep.subr.bf16.mxu0 %v240_v2 }
  0x2c   :  { %201 = vmatpush3.bf16.xpose.msra.mxu0 %v200_v19 }
  0x2d   :  { %202 = vmatprep.subr.bf16.mxu0 %v240_v2 }
  0x34   :  { %204 = vmatpush3.bf16.xpose.msra.mxu0 %v203_v22 }
  0x35   :  { %205 = vmatprep.subr.bf16.mxu0 %v240_v2 }
  0x3c   :  { %207 = vmatpush3.bf16.xpose.msra.mxu0 %v206_v25 }
  0x43   :  { %182 = vmatmul.mubr.f32.vlgmr.msra.gmra.mrb[0].mxu0 %v15_v26 }
 0x116   :  { %v105_v28 = vpop.f32.mrb[0].mxu0 }
 0x117   :  { %v106_v29 = vadd.f32 %v130_v27, %v105_v28  ;;  %v183_v30 = vpop.f32.mrb[1].mxu0 }
 0x119   :  { %v131_v31 = vmul.f32 -1.442695, %v106_v29 }
 0x11b   :  { %212 = vpow2.f32 %v131_v31 }
 0x125   :  { %v213_v32 = vpop.eup %212 }
 0x126   :  { %v112_v33 = vadd.f32 1.0, %v213_v32 }
 0x128   :  { %214 = vrcp.f32 %v112_v33 }
 0x132   :  { %v215_v34 = vpop.eup %214 }
 0x133   :  { %115 = vst [vmem:[#allocation2] sm:$0xff] %v215_v34 }
 0x134   :  { %227 = shalt.err (!%p224_p4)
}
 0x135   :  { %s228_s23 = scalar_lea.hbm %s333_s3, 128 }
 0x136   :  { %p229_p5 = scmp.ne.s32.totalorder %s333_s3, %s228_s23  ;;  %p232_p6 = scmp.lt.u32.totalorder %s228_s23, %s333_s3 }
 0x138   :  { %p234_p7 = pnand %p232_p6, %p229_p5 }
 0x13a   :  { %237 = shalt.err (!%p234_p7)
}
 0x13b   :  { %125 = dma.vmem_to_hbm [thread:$0]  %s123_s21, 128, %s333_s3, [#allocation3]  }
 0x13c   :  { %238 = dma.done.wait [#allocation3], 128  }
 0x13d   :  { %239 = vsyncadd [#allocation3], 4294967168 }
 0x13e   :  { %129 = vsyncpa [#allocation3], 1 }

</bundles_post_ra>
